<compile_context>
chip_gen: v7x
topology: tpu7x:2x2x1
jax: 0.10.0
libtpu: 0.0.40
codegen_flags: <defaults>
</compile_context>

<pallas_src>
import functools

import jax
import jax.numpy as jnp
from jax.experimental import pallas as pl
from jax.experimental.pallas import tpu as pltpu


def _round_up(x, m):
    return (x + m - 1) // m * m


def _vmem_capacity_bytes():
    try:
        return int(pltpu.get_tpu_info().vmem_capacity_bytes)
    except Exception:
        return 64 * 1024 * 1024  # conservative (v7x-sized) fallback


def _valid_ths(H):
    cands = [t for t in (1024, 512, 256, 128) if H % t == 0]
    return cands if cands else [H]


def _ffn_kernel(x_ref, w13_ref, w2_ref, o_ref, acc_ref, *, th):
    # Grid: (i token blocks [parallel], j output-D blocks [parallel],
    #        k hidden-dim blocks [arbitrary, reduction — innermost]).
    k = pl.program_id(2)
    n_k = pl.num_programs(2)

    @pl.when(k == 0)
    def _():
        acc_ref[...] = jnp.zeros_like(acc_ref)

    x = x_ref[...].astype(jnp.bfloat16)                       # [tm, D]
    # Single fused MXU matmul for the interleaved w1|w3 block: [tm, 2*th] f32.
    h13 = jnp.dot(x, w13_ref[...], preferred_element_type=jnp.float32)
    h1 = h13[:, :th]                                          # x @ w1 block
    h3 = h13[:, th:]                                          # x @ w3 block
    gated = (h1 * jax.nn.sigmoid(h1)) * h3                    # silu(h1)*h3, f32

    # Accumulate the partial down-projection into the VMEM f32 scratch.
    acc_ref[...] += jnp.dot(gated.astype(w2_ref.dtype), w2_ref[...],
                            preferred_element_type=jnp.float32)

    # Write the output block once, in out dtype, on the last reduction step.
    @pl.when(k == n_k - 1)
    def _():
        o_ref[...] = acc_ref[...].astype(o_ref.dtype)


def prepare_ffn_weights(w1, w3, w2, *, th=None):
    """One-time (weight-load-time) fusion/cast.

    w1, w3: [D, H]   w2: [H, D]   (math-major, i.e. torch weights transposed)
    Returns (w13 [D, 2H] bf16 interleaved per th-block, w2 bf16, th).
    """
    D, H = w1.shape
    if th is None:
        big = _vmem_capacity_bytes() >= 96 * 1024 * 1024
        th = 512 if big else 256                 # v5e/v6e vs v7x default
    ths = _valid_ths(H)
    th = next((t for t in ths if t <= th), ths[-1])
    n_h = H // th
    # Block k (width 2*th) of w13 holds [w1 block k | w3 block k].
    w13 = jnp.concatenate(
        [w1.reshape(D, n_h, th), w3.reshape(D, n_h, th)], axis=2
    ).reshape(D, 2 * H).astype(jnp.bfloat16)
    return w13, w2.astype(jnp.bfloat16), th


def feed_forward(x, w13, w2b, th, *, tm=None, tn=None):
    """SwiGLU FFN:  out = (silu(x @ w1) * (x @ w3)) @ w2.

    x   : [..., D] activations (any float dtype; bf16 MXU math, f32 accum)
    w13 : [D, 2H]  fused/interleaved bf16 weight from prepare_ffn_weights
    w2b : [H, D]   bf16 down projection
    th  : hidden-dim tile used when w13 was fused
    tn  : optional output-D tile (< D) — gives both v7x TensorCores work for
          decode-sized batches.  TODO(synk): auto-enable based on TC count.
    Returns [..., D] in x.dtype.
    """
    orig_shape = x.shape
    D = orig_shape[-1]
    x2 = x.reshape(-1, D)
    M = x2.shape[0]
    H = w13.shape[1] // 2
    assert H % th == 0
    n_h = H // th
    out_dtype = x.dtype
    out_bytes = jnp.dtype(out_dtype).itemsize
    x_bytes = jnp.dtype(x2.dtype).itemsize

    vmem_cap = _vmem_capacity_bytes()
    big = vmem_cap >= 96 * 1024 * 1024
    if tm is None:
        tm = 1024 if big else 512                # big tiles on 128 MiB parts

    # Token dim: pad only to a multiple of 16 (<=15 rows), ragged blocks are
    # otherwise handled by Pallas boundary blocks via pl.cdiv.
    Mp = _round_up(M, 16)
    tm = max(16, min(_round_up(tm, 16), Mp))
    if Mp != M:
        x2 = jnp.pad(x2, ((0, Mp - M), (0, 0)))

    if tn is None:
        tn = D
    assert D % tn == 0 and (tn % 128 == 0 or tn == D)
    n_d = D // tn

    budget = int(vmem_cap * 0.8)                 # headroom for compiler scratch

    def vmem_need(tm_):
        return (2 * tm_ * D * x_bytes            # x blocks (double-buffered)
                + 2 * D * 2 * th * 2             # fused w1|w3 block (bf16)
                + 2 * th * tn * 2                # w2 block (bf16)
                + 2 * tm_ * tn * out_bytes       # output block
                + tm_ * tn * 4                   # f32 accumulator scratch
                + tm_ * 2 * th * 4               # h13 intermediate (f32)
                + tm_ * th * 6)                  # gated f32 + bf16 copy

    # Shrink tm (never th — the weight interleave is fixed) until we fit.
    while tm > 16 and vmem_need(tm) > budget:
        tm = max(16, _round_up(tm // 2, 16))

    vmem_limit = int(min(vmem_cap, max(vmem_need(tm) * 1.4, 32 * 1024 * 1024)))

    grid = (pl.cdiv(Mp, tm), n_d, n_h)

    cost = pl.CostEstimate(
        flops=int(6 * Mp * D * H),
        transcendentals=int(Mp * H * n_d),
        bytes_accessed=int(Mp * D * x_bytes * n_d          # x (re-read per j)
                           + grid[0] * n_d * 2 * D * H * 2  # w13 per (i, j)
                           + grid[0] * H * D * 2            # w2 per i
                           + Mp * D * out_bytes),           # output
    )

    out = pl.pallas_call(
        functools.partial(_ffn_kernel, th=th),
        out_shape=jax.ShapeDtypeStruct((Mp, D), out_dtype),
        grid_spec=pltpu.PrefetchScalarGridSpec(
            num_scalar_prefetch=0,
            grid=grid,
            in_specs=[
                pl.BlockSpec((tm, D), lambda i, j, k: (i, 0)),       # x tokens
                pl.BlockSpec((D, 2 * th), lambda i, j, k: (0, k)),   # w1|w3
                pl.BlockSpec((th, tn), lambda i, j, k: (k, j)),      # w2
            ],
            out_specs=pl.BlockSpec((tm, tn), lambda i, j, k: (i, j)),
            scratch_shapes=[pltpu.VMEM((tm, tn), jnp.float32)],      # f32 acc
        ),
        compiler_params=pltpu.CompilerParams(
            dimension_semantics=("parallel", "parallel", "arbitrary"),
            vmem_limit_bytes=vmem_limit,
        ),
        cost_estimate=cost,
    )(x2, w13, w2b)

    if Mp != M:
        out = out[:M]
    return out.reshape(orig_shape)


def _llama_hidden_dim(dim, multiple_of=256, ffn_dim_multiplier=None):
    hidden_dim = 4 * dim
    hidden_dim = int(2 * hidden_dim / 3)
    if ffn_dim_multiplier is not None:
        hidden_dim = int(ffn_dim_multiplier * hidden_dim)
    return multiple_of * ((hidden_dim + multiple_of - 1) // multiple_of)


if __name__ == "__main__":
    key = jax.random.PRNGKey(0)
    ok = True

    # Case 1: dim=128 -> hidden=512 (default tiling, tn = D).
    # Case 2: dim=256 -> hidden=768; exercises the output-D split (tn = D//2)
    #         used for decode-sized batches on 2-TC parts.
    cases = [
        dict(batch=2, seq=8, dim=128, tn=None),
        dict(batch=2, seq=4, dim=256, tn=128),
    ]

    for c in cases:
        dim = c["dim"]
        hidden = _llama_hidden_dim(dim, multiple_of=256)
        key, kx, k1, k2, k3 = jax.random.split(key, 5)

        x = jax.random.normal(kx, (c["batch"], c["seq"], dim), dtype=jnp.float32)
        # PyTorch nn.Linear weight shape is (out_features, in_features); we
        # store the transpose so the kernel does x @ W directly.
        w1 = (jax.random.normal(k1, (hidden, dim), dtype=jnp.float32)
              * (1.0 / dim ** 0.5)).T                       # [D, H]
        w3 = (jax.random.normal(k3, (hidden, dim), dtype=jnp.float32)
              * (1.0 / dim ** 0.5)).T                       # [D, H]
        w2 = (jax.random.normal(k2, (dim, hidden), dtype=jnp.float32)
              * (1.0 / hidden ** 0.5)).T                    # [H, D]

        # One-time weight preparation (fusion + bf16 cast).
        w13, w2b, th = prepare_ffn_weights(w1, w3, w2)

        out = feed_forward(x, w13, w2b, th, tn=c["tn"])
        jax.block_until_ready(out)

        # Pure-JAX f32 reference (kernel computes in bf16 with f32 accum).
        h = x @ w1
        ref = ((h * jax.nn.sigmoid(h)) * (x @ w3)) @ w2
        if not jnp.allclose(out, ref, atol=5e-2, rtol=5e-2):
            ok = False

    if ok:
        print("KERNEL_OK")
</pallas_src>

<mosaic_0001>
module attributes {stable_mosaic.version = 11 : i64} {
  func.func @_ffn_kernel(%arg0: i32, %arg1: i32, %arg2: i32, %arg3: memref<16x128xf32, #tpu.memory_space<vmem>>, %arg4: memref<128x512xbf16, #tpu.memory_space<vmem>>, %arg5: memref<256x128xbf16, #tpu.memory_space<vmem>>, %arg6: memref<16x128xf32, #tpu.memory_space<vmem>>, %arg7: memref<16x128xf32, #tpu.memory_space<vmem>>) attributes {dimension_semantics = [#tpu.dimension_semantics<parallel>, #tpu.dimension_semantics<parallel>, #tpu.dimension_semantics<arbitrary>], iteration_bounds = array<i64: 1, 1, 2>, scalar_prefetch = 0 : i64, scratch_operands = 1 : i64, tpu.core_type = #tpu.core_type<tc>, window_params = [{transform_indices = @transform_0, window_bounds = array<i64: 16, 128>}, {transform_indices = @transform_1, window_bounds = array<i64: 128, 512>}, {transform_indices = @transform_2, window_bounds = array<i64: 256, 128>}, {transform_indices = @transform_3, window_bounds = array<i64: 16, 128>}]} {
    %c0_i32 = arith.constant 0 : i32
    %0 = arith.cmpi eq, %arg2, %c0_i32 : i32
    %1 = arith.extui %0 : i1 to i32
    %c0_i32_0 = arith.constant 0 : i32
    %2 = arith.cmpi ne, %1, %c0_i32_0 : i32
    scf.if %2 {
      %cst_13 = arith.constant 0.000000e+00 : f32
      %25 = vector.broadcast %cst_13 : f32 to vector<16x128xf32>
      %c0_14 = arith.constant 0 : index
      %c0_15 = arith.constant 0 : index
      %26 = vector.load %arg7[%c0_14, %c0_15] : memref<16x128xf32, #tpu.memory_space<vmem>>, vector<16x128xf32>
      tpu.vector_store %arg7[%c0_14, %c0_15], %25 {strides = array<i32>} : memref<16x128xf32, #tpu.memory_space<vmem>>, vector<16x128xf32>,
    } else {
    }
    %c0 = arith.constant 0 : index
    %c0_1 = arith.constant 0 : index
    %3 = vector.load %arg3[%c0, %c0_1] : memref<16x128xf32, #tpu.memory_space<vmem>>, vector<16x128xf32>
    %4 = arith.truncf %3 : vector<16x128xf32> to vector<16x128xbf16>
    %c0_2 = arith.constant 0 : index
    %c0_3 = arith.constant 0 : index
    %5 = vector.load %arg4[%c0_2, %c0_3] : memref<128x512xbf16, #tpu.memory_space<vmem>>, vector<128x512xbf16>
    %cst = arith.constant dense<0.000000e+00> : vector<16x512xf32>
    %6 = tpu.matmul %4, %5, %cst {dimension_numbers = #tpu.dot_dimension_numbers<[1], [0], [0], [1], [0, 0, 1, 1], [], []>} : vector<16x128xbf16>, vector<128x512xbf16>, vector<16x512xf32> -> vector<16x512xf32>
    %7 = vector.extract_strided_slice %6 {offsets = [0, 0], sizes = [16, 256], strides = [1, 1]} : vector<16x512xf32> to vector<16x256xf32>
    %8 = vector.extract_strided_slice %6 {offsets = [0, 256], sizes = [16, 256], strides = [1, 1]} : vector<16x512xf32> to vector<16x256xf32>
    %9 = arith.negf %7 : vector<16x256xf32>
    %10 = math.exp %9 : vector<16x256xf32>
    %cst_4 = arith.constant 1.000000e+00 : f32
    %11 = vector.broadcast %cst_4 : f32 to vector<16x256xf32>
    %12 = arith.addf %11, %10 : vector<16x256xf32>
    %13 = arith.divf %11, %12 : vector<16x256xf32>
    %14 = arith.mulf %7, %13 : vector<16x256xf32>
    %15 = arith.mulf %14, %8 : vector<16x256xf32>
    %c0_5 = arith.constant 0 : index
    %c0_6 = arith.constant 0 : index
    %16 = vector.load %arg7[%c0_5, %c0_6] : memref<16x128xf32, #tpu.memory_space<vmem>>, vector<16x128xf32>
    %17 = arith.truncf %15 : vector<16x256xf32> to vector<16x256xbf16>
    %c0_7 = arith.constant 0 : index
    %c0_8 = arith.constant 0 : index
    %18 = vector.load %arg5[%c0_7, %c0_8] : memref<256x128xbf16, #tpu.memory_space<vmem>>, vector<256x128xbf16>
    %cst_9 = arith.constant dense<0.000000e+00> : vector<16x128xf32>
    %19 = tpu.matmul %17, %18, %cst_9 {dimension_numbers = #tpu.dot_dimension_numbers<[1], [0], [0], [1], [0, 0, 1, 1], [], []>} : vector<16x256xbf16>, vector<256x128xbf16>, vector<16x128xf32> -> vector<16x128xf32>
    %20 = arith.addf %16, %19 : vector<16x128xf32>
    %c0_10 = arith.constant 0 : index
    %c0_11 = arith.constant 0 : index
    %21 = vector.load %arg7[%c0_10, %c0_11] : memref<16x128xf32, #tpu.memory_space<vmem>>, vector<16x128xf32>
    tpu.vector_store %arg7[%c0_10, %c0_11], %20 {strides = array<i32>} : memref<16x128xf32, #tpu.memory_space<vmem>>, vector<16x128xf32>,
    %c1_i32 = arith.constant 1 : i32
    %22 = arith.cmpi eq, %arg2, %c1_i32 : i32
    %23 = arith.extui %22 : i1 to i32
    %c0_i32_12 = arith.constant 0 : i32
    %24 = arith.cmpi ne, %23, %c0_i32_12 : i32
    scf.if %24 {
      %c0_13 = arith.constant 0 : index
      %c0_14 = arith.constant 0 : index
      %25 = vector.load %arg7[%c0_13, %c0_14] : memref<16x128xf32, #tpu.memory_space<vmem>>, vector<16x128xf32>
      %c0_15 = arith.constant 0 : index
      %c0_16 = arith.constant 0 : index
      %26 = vector.load %arg6[%c0_15, %c0_16] : memref<16x128xf32, #tpu.memory_space<vmem>>, vector<16x128xf32>
      tpu.vector_store %arg6[%c0_15, %c0_16], %25 {strides = array<i32>} : memref<16x128xf32, #tpu.memory_space<vmem>>, vector<16x128xf32>,
    } else {
    }
    return
  }
  func.func @transform_0(%arg0: i32, %arg1: i32, %arg2: i32) -> (i32, i32) {
    %c0_i32 = arith.constant 0 : i32
    %c0_i32_0 = arith.constant 0 : i32
    return %arg0, %c0_i32 : i32, i32
  }
  func.func @transform_1(%arg0: i32, %arg1: i32, %arg2: i32) -> (i32, i32) {
    %c0_i32 = arith.constant 0 : i32
    %c0_i32_0 = arith.constant 0 : i32
    return %c0_i32, %arg2 : i32, i32
  }
  func.func @transform_2(%arg0: i32, %arg1: i32, %arg2: i32) -> (i32, i32) {
    %c0_i32 = arith.constant 0 : i32
    return %arg2, %arg1 : i32, i32
  }
  func.func @transform_3(%arg0: i32, %arg1: i32, %arg2: i32) -> (i32, i32) {
    %c0_i32 = arith.constant 0 : i32
    return %arg0, %arg1 : i32, i32
  }
}

</mosaic_0001>

<bundles_post_ra>
// kernel: tpu_custom_call.1
= control target key start
LH: loop header
LB: loop body
LE: loop exit
PB: predicated region body
PF: predicated region fallthrough
CT: control target
= control target key end

     0   :  { %8 = vsyncpa [#allocation4], 0  ;;  %s1641_s0 = inlined_call_operand.hbm [shape: f32[16,128], index: 0, kind: input, shape index: {}]   ;;  %s1642_s1 = inlined_call_operand.hbm [shape: bf16[128,1024], index: 1, kind: input, shape index: {}]   ;;  %s1643_s2 = inlined_call_operand.hbm [shape: bf16[512,128], index: 2, kind: input, shape index: {}]   ;;  %s1644_s3 = inlined_call_operand.hbm [shape: f32[16,128], index: 3, kind: output, shape index: {}]  }
   0x1   :  { %9 = vsyncpa [#allocation7], 0 }
   0x2   :  { %11 = vsyncpa [#allocation7 + $0x1], 0 }
   0x3   :  { %12 = vsyncpa [#allocation5], 0  ;;  %s1364_s12 = smov 0   ;;  %s1366_s13 = smov 0  }
   0x4   :  { %s1368_s14 = smov 0   ;;  %s1370_s15 = smov 0  }
   0x5   :  { %s1372_s16 = smov 0   ;;  %s1374_s17 = smov 0  }
   0x6 LB: > { %s30_s18 = sadd.s32 1, %s1323_s16  ;;  %s70_s19 = sadd.s32 1, %s1315_s14  ;;  %s1327_s17 = sphi %s1374_s17, %s18_s17   ;;  %s1323_s16 = sphi %s1372_s16, %s1666_s16   ;;  %s1319_s15 = sphi %s1370_s15, %s1665_s15   ;;  %s1315_s14 = sphi %s1368_s14, %s1664_s14   ;;  %s1311_s13 = sphi %s1366_s13, %s1663_s13   ;;  %s1307_s12 = sphi %s1364_s12, %s1662_s12  }
   0x7   : > { %p31_p0 = scmp.ge.s32.totalorder %s30_s18, 2  ;;  %p77_p1 = scmp.ne.s32.totalorder %s1315_s14, %s1311_s13 }
   0x8   : > { %p78_p2 = scmp.eq.s32.totalorder %s1327_s17, 0  ;;  %p1010_p4 = scmp.lt.s32.totalorder %s1327_s17, 2 }
   0x9   : > { %s1668_s18 = smov (%p31_p0, %s30_s18), 0  ;;  %s179_s21 = sand.u32 1, %s1327_s17  }
   0xa   : > { %p79_p3 = por %p78_p2, %p77_p1  ;;  %s67_s20 = ssub.s32 %s1323_s16, %s1668_s18 }
   0xb   : > { %p68_p5 = scmp.eq.s32.totalorder %s67_s20, 0  ;;  %s181_s22 = sand.u32 1, %s1315_s14  }
   0xc   : > { %s962_s23 = sshll.u32 %s1323_s16, 8  ;;  %s894_s25 = sshll.u32 %s181_s22, 8 }
   0xd   : > { %s1408_s24 = scalar_select %p68_p5, %s1315_s14, %s70_s19  }
   0xe   : > { %s1415_s28 = scalar_lea.hbm %s1642_s1, %s962_s23  ;;  %p1417_p6 = pnand %p1010_p4, %p79_p3 }
   0xf   : > { %s183_s30 = scalar_lea.vmem [#allocation6], %s894_s25  ;;  %s1423_s5 = scalar_lea.sflag [#allocation7], %s179_s21 }
  0x10   : > { %s1651_s29 = scalar_select %p1417_p6, 1, 0 }
  0x11   : > { %s190_s4 = sshll.u32 %s183_s30, 4  ;;  %s1155_s6 = scalar_lea.hbm %s1415_s28, 4096  ;;  %s1421_s4 = int_to_ptr.vmem [resolvable:$true] %s190_s4 }
  0x12   : > { %p1156_p7 = scmp.ne.s32.totalorder %s1415_s28, %s1155_s6  ;;  %p1646_p8 = pneg %p1417_p6 }
  0x13   : > { %s1160_s9 = scalar_lea.hbm %s1642_s1, 8192  ;;  %p1161_p11 = scmp.lt.u32.totalorder %s1415_s28, %s1642_s1 }
  0x14   : > { %p1158_p9 = pnand %p1646_p8, %p1156_p7  ;;  %p1162_p12 = scmp.lt.u32.totalorder %s1160_s9, %s1155_s6 }
  0x15   : > { %p1164_p0 = scmp.lt.u32.totalorder %s1155_s6, %s1415_s28 }
  0x16   : > { %p1159_p10 = pneg %p1158_p9  ;;  %p1163_p13 = por %p1162_p12, %p1161_p11 }
  0x18   : > { %p1165_p1 = por %p1164_p0, %p1163_p13 }
  0x1a   : > { %p1166_p2 = pnand %p1165_p1, %p1159_p10 }
  0x1c   : > { %1169 = shalt.err (!%p1166_p2)
}
  0x1d   : > { %s1170_s19 = scalar_lea.vmem %s1421_s4, 4096  ;;  %s1329_s20 = smov [#allocation6]  }
  0x1e   : > { %p1171_p3 = scmp.ne.s32.totalorder %s1421_s4, %s1170_s19  ;;  %s1175_s21 = sshll.u32 %s1329_s20, 4  ;;  %s1176_s21 = int_to_ptr.vmem [resolvable:$false] %s1175_s21 }
  0x1f   : > { %s1177_s23 = scalar_lea.vmem %s1176_s21, 8192  ;;  %p1178_p7 = scmp.lt.s32.totalorder %s1421_s4, %s1176_s21 }
  0x20   : > { %p1173_p4 = pnand %p1171_p3, %p1646_p8  ;;  %p1179_p9 = scmp.lt.s32.totalorder %s1177_s23, %s1170_s19 }
  0x22   : > { %p1174_p5 = pneg %p1173_p4  ;;  %p1180_p11 = por %p1179_p9, %p1178_p7 }
  0x24   : > { %p1181_p12 = pnand %p1180_p11, %p1174_p5 }
  0x26   : > { %1184 = shalt.err (!%p1181_p12)
}
  0x27   : > { %s1330_s25 = smov 512   ;;  %s1331_s26 = smov 256  }
  0x28   : > { %s1332_s27 = smov 16   ;;  %s1452_s30 = sadd.s32 4294967295, %s1327_s17  }
  0x29   : > { %1005 = dma.hbm_to_vmem [thread:$0]  (!%p1417_p6), %s1415_s28, 4096, %s1421_s4, %s1423_s5, %s1330_s25, %s1331_s26, %s1332_s27  }
  0x2a   : > { %p83_p10 = scmp.ne.s32.totalorder %s1311_s13, %s1307_s12  ;;  %p1645_p13 = scmp.eq.s32.totalorder %s1452_s30, 0 }
  0x2b   : > { %p891_p0 = scmp.ge.s32.totalorder %s1327_s17, 1  ;;  %p150_p1 = scmp.lt.s32.totalorder %s1327_s17, 3 }
  0x2c   : > { %p1461_p2 = por %p1645_p13, %p83_p10  ;;  %s1333_s28 = smov [#allocation3]  }
  0x2d   : > { %p1465_p3 = pnand %p891_p0, %p150_p1  ;;  %s165_s4 = sshll.u32 %s1333_s28, 4  ;;  %s1469_s4 = int_to_ptr.vmem [resolvable:$true] %s165_s4 }
  0x2e   : > { %s1652_s6 = scalar_select %p1461_p2, 1, 0 }
  0x2f   : > { %s1653_s7 = scalar_select %p1465_p3, 1, 0 }
  0x30   : > { %p998_p4 = pneg %p1465_p3  ;;  %s897_s12 = sshll.u32 %s181_s22, 7 }
  0x31   : > { %s963_s8 = sshll.u32 %s1323_s16, 11  ;;  %s204_s20 = scalar_lea.vmem [#allocation8], %s897_s12 }
  0x32   : > { %p1478_p5 = pnand %p998_p4, %p1645_p13  ;;  %s1485_s19 = scalar_lea.hbm %s1643_s2, %s963_s8 }
  0x33   : > { %s212_s21 = sshll.u32 %s204_s20, 4  ;;  %s1185_s22 = scalar_lea.hbm %s1641_s0, 256  ;;  %s1487_s21 = int_to_ptr.vmem [resolvable:$true] %s212_s21 }
  0x34   : > { %p1186_p7 = scmp.ne.s32.totalorder %s1641_s0, %s1185_s22  ;;  %p1187_p9 = pneg %p1478_p5 }
  0x35   : > { %p1192_p10 = scmp.lt.u32.totalorder %s1185_s22, %s1641_s0 }
  0x36   : > { %p1188_p11 = pnand %p1187_p9, %p1186_p7 }
  0x38   : > { %p1189_p12 = pneg %p1188_p11 }
  0x3a   : > { %p1194_p0 = pnand %p1192_p10, %p1189_p12 }
  0x3c   : > { %1197 = shalt.err (!%p1194_p0)
}
  0x3d   : > { %s1198_s12 = scalar_lea.vmem %s1469_s4, 256  ;;  %p1206_p8 = scmp.lt.s32.totalorder %s1469_s4, %s1469_s4 }
  0x3e   : > { %p1199_p1 = scmp.ne.s32.totalorder %s1469_s4, %s1198_s12  ;;  %p1207_p2 = scmp.lt.s32.totalorder %s1198_s12, %s1198_s12 }
  0x40   : > { %p1201_p4 = pnand %p1199_p1, %p1187_p9  ;;  %p1208_p3 = por %p1207_p2, %p1206_p8 }
  0x42   : > { %p1202_p13 = pneg %p1201_p4 }
  0x44   : > { %p1209_p6 = pnand %p1208_p3, %p1202_p13 }
  0x46   : > { %1212 = shalt.err (!%p1209_p6)
}
  0x47   : > { %s1334_s8 = smov 128   ;;  %s1335_s11 = smov 8  }
  0x48   : > { %1001 = dma.hbm_to_vmem [thread:$0]  (!%p1478_p5), %s1641_s0, 256, %s1469_s4, [#allocation4], %s1334_s8, %s1334_s8, %s1335_s11  }
  0x49   : > { %s1213_s25 = scalar_lea.hbm %s1485_s19, 2048  ;;  %p1655_p9 = scmp.ne.s32.totalorder %s1651_s29, 0 }
  0x4a   : > { %p1214_p7 = scmp.ne.s32.totalorder %s1485_s19, %s1213_s25  ;;  %s1218_s27 = scalar_lea.hbm %s1643_s2, 4096 }
  0x4b   : > { %p1656_p8 = pneg %p1655_p9  ;;  %p1219_p2 = scmp.lt.u32.totalorder %s1485_s19, %s1643_s2 }
  0x4c   : > { %p1220_p3 = scmp.lt.u32.totalorder %s1218_s27, %s1213_s25  ;;  %p1222_p12 = scmp.lt.u32.totalorder %s1213_s25, %s1485_s19 }
  0x4d   : > { %p1216_p13 = pnand %p1214_p7, %p1656_p8 }
  0x4e   : > { %p1221_p11 = por %p1220_p3, %p1219_p2 }
  0x4f   : > { %p1217_p6 = pneg %p1216_p13 }
  0x50   : > { %p1223_p10 = por %p1222_p12, %p1221_p11 }
  0x52   : > { %p1224_p0 = pnand %p1223_p10, %p1217_p6 }
  0x54   : > { %1227 = shalt.err (!%p1224_p0)
}
  0x55   : > { %s1228_s4 = scalar_lea.vmem %s1487_s21, 2048  ;;  %p1657_p1 = pmov %p1656_p8 }
  0x56   : > { %p1229_p5 = scmp.ne.s32.totalorder %s1487_s21, %s1228_s4  ;;  %s1336_s9 = smov [#allocation8]  }
  0x57   : > { %s1233_s12 = sshll.u32 %s1336_s9, 4  ;;  %s1234_s12 = int_to_ptr.vmem [resolvable:$false] %s1233_s12 }
  0x58   : > { %p1231_p4 = pnand %p1229_p5, %p1657_p1  ;;  %s1235_s8 = scalar_lea.vmem %s1234_s12, 4096 }
  0x59   : > { %p1236_p8 = scmp.lt.s32.totalorder %s1487_s21, %s1234_s12  ;;  %p1237_p13 = scmp.lt.s32.totalorder %s1235_s8, %s1228_s4 }
  0x5a   : > { %p1232_p7 = pneg %p1231_p4 }
  0x5b   : > { %p1238_p2 = por %p1237_p13, %p1236_p8 }
  0x5d   : > { %p1239_p3 = pnand %p1238_p2, %p1232_p7 }
  0x5f   : > { %1242 = shalt.err (!%p1239_p3)
}
  0x60   : > { %s1337_s11 = smov 64   ;;  %s1338_s20 = smov 4  }
  0x61   : > { %1008 = dma.hbm_to_vmem [thread:$0]  (!%p1655_p9), %s1485_s19, 2048, %s1487_s21, %s1423_s5, %s1337_s11, %s1337_s11, %s1338_s20  }
  0x62   : > { %p1658_p6 = scmp.ne.s32.totalorder %s1653_s7, 0 }
  0x63   : > { %p1659_p11 = scmp.eq.s32.totalorder (!%p1658_p6), %s1452_s30, 0 }
  0x64   : > { %224 = sbr.rel (%p1658_p6) target bundleno = 658 (0x292), region = 32 }
  0x6b   : > { %1294 = dma.done.wait (%p1659_p11), [#allocation4], 256   ;;  %p1660_p12 = pmov %p1659_p11 }
  0x6c   : > { %s230_s23 = sand.u32 1, %s1452_s30   ;;  %s232_s25 = sand.u32 1, %s1311_s13  }
  0x6d   : > { %1296 = vsyncadd (%p1660_p12), [#allocation4], 4294967040  ;;  %s902_s22 = sshll.u32 %s232_s25, 8  ;;  %s231_s26 = scalar_lea.sflag [#allocation7], %s230_s23 }
  0x6e   : > { %s1542_s27 = scalar_lea.vmem [#allocation6], %s902_s22  ;;  %p1661_p10 = scmp.ne.s32.totalorder %s1652_s6, 0 }
  0x70   : > { %1298 = dma.done.wait (%p1661_p10), %s231_s26, 6144  }
  0x71   : > { %1300 = vsyncadd (%p1661_p10), %s231_s26, 4294961152  ;;  %s903_s29 = sshll.u32 %s232_s25, 7  ;;  %p904_p9 = scmp.ne.s32.totalorder %s1319_s15, 0 }
  0x72   : > { %s1548_s5 = scalar_lea.vmem [#allocation8], %s903_s29  ;;  %v1339_v0 = vmov (!%p904_p9), 0.0  }
  0x73   : > { %274 = sbr.rel (%p904_p9) target bundleno = 122 (0x7a), region = 48  ;;  %275 = vst [vmem:[#allocation2] sm:$0xff] (!%p904_p9), %v1339_v0  ;;  %276 = vst [vmem:[#allocation2 + $0x8] sm:$0xff] (!%p904_p9), %v1339_v0 }
  0x7a PF: > { %v1075_v1 = vld [vmem:[%s1542_s27 + $0x4] ss:$16 sps:$4 sm:$0xff]   ;;  %v1077_v2 = vld [vmem:[%s1542_s27] ss:$16 sps:$4 sm:$0xff]   ;;  %v1340_v3 = vmov 0   ;;  %v278_v30 = vld [vmem:[#allocation3 + $0x8] sm:$0xff] }
  0x7b   : > { %504 = vmatprep.mubr.bf16.mxu0 %v1340_v3  ;;  %547 = vmatprep.mubr.bf16.mxu1 %v1340_v3  ;;  %v1078_v4 = vld [vmem:[%s1542_s27 + $0x24] ss:$16 sps:$4 sm:$0xff]   ;;  %v1080_v5 = vld [vmem:[%s1542_s27 + $0x20] ss:$16 sps:$4 sm:$0xff]   ;;  %v1096_v9 = vld [vmem:[%s1542_s27 + $0xc] ss:$16 sps:$4 sm:$0xff]  }
  0x7c   : > { %472 = vmatprep.subr.bf16.mxu0 %v1075_v1  ;;  %v1081_v6 = vld [vmem:[%s1542_s27 + $0x44] ss:$16 sps:$4 sm:$0xff]   ;;  %v1083_v7 = vld [vmem:[%s1542_s27 + $0x40] ss:$16 sps:$4 sm:$0xff]   ;;  %v1098_v10 = vld [vmem:[%s1542_s27 + $0x8] ss:$16 sps:$4 sm:$0xff]   ;;  %515 = vmatprep.subr.bf16.mxu1 %v1096_v9 }
  0x7d   : > { %473 = vmatpush1.bf16.msra.mxu0 %v1077_v2  ;;  %v1084_v8 = vld [vmem:[%s1542_s27 + $0x64] ss:$16 sps:$4 sm:$0xff]   ;;  %v1086_v11 = vld [vmem:[%s1542_s27 + $0x60] ss:$16 sps:$4 sm:$0xff]   ;;  %v1102_v13 = vld [vmem:[%s1542_s27 + $0x2c] ss:$16 sps:$4 sm:$0xff]   ;;  %516 = vmatpush1.bf16.msra.mxu1 %v1098_v10 }
  0x7e   : > { %474 = vmatprep.subr.bf16.mxu0 %v1078_v4  ;;  %v1087_v12 = vld [vmem:[%s1542_s27 + $0x84] ss:$16 sps:$4 sm:$0xff]   ;;  %v1104_v14 = vld [vmem:[%s1542_s27 + $0x28] ss:$16 sps:$4 sm:$0xff]   ;;  %517 = vmatprep.subr.bf16.mxu1 %v1102_v13  ;;  %v1105_v15 = vld [vmem:[%s1542_s27 + $0x4c] ss:$16 sps:$4 sm:$0xff]  }
  0x7f   : > { %v1089_v16 = vld [vmem:[%s1542_s27 + $0x80] ss:$16 sps:$4 sm:$0xff]   ;;  %v1090_v17 = vld [vmem:[%s1542_s27 + $0xa4] ss:$16 sps:$4 sm:$0xff]   ;;  %v1107_v18 = vld [vmem:[%s1542_s27 + $0x48] ss:$16 sps:$4 sm:$0xff]  }
  0x80   : > { %v1108_v19 = vld [vmem:[%s1542_s27 + $0x6c] ss:$16 sps:$4 sm:$0xff]   ;;  %v1092_v20 = vld [vmem:[%s1542_s27 + $0xa0] ss:$16 sps:$4 sm:$0xff]   ;;  %v1093_v21 = vld [vmem:[%s1542_s27 + $0xc4] ss:$16 sps:$4 sm:$0xff]  }
  0x81   : > { %475 = vmatpush1.bf16.msra.mxu0 %v1080_v5  ;;  %518 = vmatpush1.bf16.msra.mxu1 %v1104_v14  ;;  %v1095_v22 = vld [vmem:[%s1542_s27 + $0xc0] ss:$16 sps:$4 sm:$0xff]   ;;  %v1110_v23 = vld [vmem:[%s1542_s27 + $0x68] ss:$16 sps:$4 sm:$0xff]   ;;  %v1111_v24 = vld [vmem:[%s1542_s27 + $0x8c] ss:$16 sps:$4 sm:$0xff]  }
  0x82   : > { %476 = vmatprep.subr.bf16.mxu0 %v1081_v6  ;;  %519 = vmatprep.subr.bf16.mxu1 %v1105_v15  ;;  %v1099_v25 = vld [vmem:[%s1542_s27 + $0xe4] ss:$16 sps:$4 sm:$0xff]   ;;  %v1113_v26 = vld [vmem:[%s1542_s27 + $0x88] ss:$16 sps:$4 sm:$0xff]   ;;  %v1114_v27 = vld [vmem:[%s1542_s27 + $0xac] ss:$16 sps:$4 sm:$0xff]  }
  0x83   : > { %v1101_v28 = vld [vmem:[%s1542_s27 + $0xe0] ss:$16 sps:$4 sm:$0xff]   ;;  %v1116_v31 = vld [vmem:[%s1542_s27 + $0xa8] ss:$16 sps:$4 sm:$0xff]   ;;  %v1117_v32 = vld [vmem:[%s1542_s27 + $0xcc] ss:$16 sps:$4 sm:$0xff]  }
  0x84   : > { %v277_v29 = vld [vmem:[#allocation3] sm:$0xff]  ;;  %v1119_v34 = vld [vmem:[%s1542_s27 + $0xc8] ss:$16 sps:$4 sm:$0xff]   ;;  %v1120_v35 = vld [vmem:[%s1542_s27 + $0xec] ss:$16 sps:$4 sm:$0xff]   ;;  %p957_p0 = scmp.ne.s32.totalorder %s1319_s15, 1 }
  0x85   : > { %477 = vmatpush1.bf16.msra.mxu0 %v1083_v7  ;;  %520 = vmatpush1.bf16.msra.mxu1 %v1107_v18  ;;  %v279_v33 = vpack.c.bf16 %v278_v30, %v277_v29  ;;  %v1122_v36 = vld [vmem:[%s1542_s27 + $0xe8] ss:$16 sps:$4 sm:$0xff]   ;;  %v1123_v37 = vld [vmem:[%s1548_s5 + $0x40] sm:$0xff]   ;;  %v1127_v41 = vld [vmem:[%s1548_s5 + $0x50] sm:$0xff]  }
  0x86   : > { %478 = vmatprep.subr.bf16.mxu0 %v1084_v8  ;;  %521 = vmatprep.subr.bf16.mxu1 %v1108_v19  ;;  %v1124_v38 = vld [vmem:[%s1548_s5] sm:$0xff]   ;;  %v1125_v39 = vld [vmem:[%s1548_s5 + $0x48] sm:$0xff]   ;;  %v1128_v42 = vld [vmem:[%s1548_s5 + $0x10] sm:$0xff]  }
  0x87   : > { %v1126_v40 = vld [vmem:[%s1548_s5 + $0x8] sm:$0xff]   ;;  %v1129_v43 = vld [vmem:[%s1548_s5 + $0x58] sm:$0xff]   ;;  %v1131_v45 = vld [vmem:[%s1548_s5 + $0x60] sm:$0xff]  }
  0x88   : > { %v1130_v44 = vld [vmem:[%s1548_s5 + $0x18] sm:$0xff]   ;;  %v1132_v46 = vld [vmem:[%s1548_s5 + $0x20] sm:$0xff]   ;;  %v1133_v47 = vld [vmem:[%s1548_s5 + $0x68] sm:$0xff]  }
  0x89   : > { %479 = vmatpush1.bf16.msra.mxu0 %v1086_v11  ;;  %522 = vmatpush1.bf16.msra.mxu1 %v1110_v23  ;;  %v1134_v48 = vld [vmem:[%s1548_s5 + $0x28] sm:$0xff]   ;;  %v1135_v49 = vld [vmem:[%s1548_s5 + $0x70] sm:$0xff]   ;;  %v1137_v51 = vld [vmem:[%s1548_s5 + $0x78] sm:$0xff]  }
  0x8a   : > { %480 = vmatprep.subr.bf16.mxu0 %v1087_v12  ;;  %523 = vmatprep.subr.bf16.mxu1 %v1111_v24  ;;  %v1136_v50 = vld [vmem:[%s1548_s5 + $0x30] sm:$0xff]   ;;  %v1138_v52 = vld [vmem:[%s1548_s5 + $0x38] sm:$0xff]   ;;  %v590_v24 = vld [vmem:[#allocation2] sm:$0xff] }
  0x8d   : > { %481 = vmatpush1.bf16.msra.mxu0 %v1089_v16  ;;  %524 = vmatpush1.bf16.msra.mxu1 %v1113_v26 }
  0x8e   : > { %482 = vmatprep.subr.bf16.mxu0 %v1090_v17  ;;  %525 = vmatprep.subr.bf16.mxu1 %v1114_v27 }
  0x91   : > { %483 = vmatpush1.bf16.msra.mxu0 %v1092_v20  ;;  %526 = vmatpush1.bf16.msra.mxu1 %v1116_v31 }
  0x92   : > { %484 = vmatprep.subr.bf16.mxu0 %v1093_v21  ;;  %527 = vmatprep.subr.bf16.mxu1 %v1117_v32 }
  0x95   : > { %485 = vmatpush1.bf16.msra.mxu0 %v1095_v22  ;;  %528 = vmatpush1.bf16.msra.mxu1 %v1119_v34 }
  0x96   : > { %486 = vmatprep.subr.bf16.mxu0 %v1099_v25  ;;  %529 = vmatprep.subr.bf16.mxu1 %v1120_v35 }
  0x99   : > { %487 = vmatpush1.bf16.msra.mxu0 %v1101_v28  ;;  %530 = vmatpush1.bf16.msra.mxu1 %v1122_v36  ;;  %v591_v28 = vld [vmem:[#allocation2 + $0x8] sm:$0xff] }
  0x9a   : > { %964 = vmatprep.subr.bf16.mxu0 %v1123_v37 }
  0x9c   : > { %505 = vmatmul.mubr.bf16.vlgmr.msra.gmra.mrb[0].mxu0 %v279_v33  ;;  %548 = vmatmul.mubr.bf16.vlgmr.msra.gmra.mrb[0].mxu1 %v279_v33 }
  0x9d   : > { %965 = vmatpush3.bf16.msra.mxu0 %v1124_v38 }
  0x9e   : > { %966 = vmatprep.subr.bf16.mxu0 %v1125_v39 }
  0xa1   : > { %967 = vmatpush3.bf16.msra.mxu0 %v1126_v40 }
  0xa2   : > { %968 = vmatprep.subr.bf16.mxu0 %v1127_v41 }
  0xa5   : > { %969 = vmatpush3.bf16.msra.mxu0 %v1128_v42 }
  0xa6   : > { %970 = vmatprep.subr.bf16.mxu0 %v1129_v43 }
  0xa9   : > { %971 = vmatpush3.bf16.msra.mxu0 %v1130_v44 }
  0xaa   : > { %972 = vmatprep.subr.bf16.mxu0 %v1131_v45 }
  0xad   : > { %973 = vmatpush3.bf16.msra.mxu0 %v1132_v46 }
  0xae   : > { %974 = vmatprep.subr.bf16.mxu0 %v1133_v47 }
  0xb1   : > { %975 = vmatpush3.bf16.msra.mxu0 %v1134_v48 }
  0xb2   : > { %976 = vmatprep.subr.bf16.mxu0 %v1135_v49 }
  0xb5   : > { %977 = vmatpush3.bf16.msra.mxu0 %v1136_v50 }
  0xb6   : > { %978 = vmatprep.subr.bf16.mxu0 %v1137_v51 }
  0xb9   : > { %979 = vmatpush3.bf16.msra.mxu0 %v1138_v52 }
 0x16f   : > { %v506_v53 = vpop.f32.mrb[0].mxu0  ;;  %v549_v61 = vpop.f32.mrb[0].mxu1 }
 0x170   : > { %v937_v54 = vmul.f32 -1.442695, %v506_v53  ;;  %v508_v55 = vpop.f32.mrb[1].mxu0  ;;  %v551_v62 = vpop.f32.mrb[1].mxu1 }
 0x171   : > { %v938_v56 = vmul.f32 -1.442695, %v508_v55  ;;  %v510_v57 = vpop.f32.mrb[2].mxu0  ;;  %v553_v63 = vpop.f32.mrb[2].mxu1 }
 0x172   : > { %1139 = vpow2.f32 %v937_v54  ;;  %v939_v58 = vmul.f32 -1.442695, %v510_v57  ;;  %v512_v59 = vpop.f32.mrb[3].mxu0  ;;  %v555_v1 = vpop.f32.mrb[3].mxu1 }
 0x173   : > { %1141 = vpow2.f32 %v938_v56  ;;  %v940_v60 = vmul.f32 -1.442695, %v512_v59 }
 0x174   : > { %1143 = vpow2.f32 %v939_v58 }
 0x175   : > { %1145 = vpow2.f32 %v940_v60 }
 0x17c   : > { %v1140_v0 = vpop.eup %1139 }
 0x17d   : > { %v1142_v2 = vpop.eup %1141  ;;  %v570_v3 = vadd.f32 1.0, %v1140_v0 }
 0x17e   : > { %v1144_v4 = vpop.eup %1143  ;;  %v571_v5 = vadd.f32 1.0, %v1142_v2 }
 0x17f   : > { %v1146_v6 = vpop.eup %1145  ;;  %1147 = vrcp.f32 %v570_v3  ;;  %v572_v7 = vadd.f32 1.0, %v1144_v4 }
 0x180   : > { %1149 = vrcp.f32 %v571_v5  ;;  %v573_v8 = vadd.f32 1.0, %v1146_v6 }
 0x181   : > { %1151 = vrcp.f32 %v572_v7 }
 0x182   : > { %1153 = vrcp.f32 %v573_v8 }
 0x189   : > { %v1148_v9 = vpop.eup %1147 }
 0x18a   : > { %v1150_v10 = vpop.eup %1149  ;;  %v582_v11 = vmul.f32 %v1148_v9, %v506_v53 }
 0x18b   : > { %v1152_v12 = vpop.eup %1151  ;;  %v583_v13 = vmul.f32 %v1150_v10, %v508_v55 }
 0x18c   : > { %v1154_v14 = vpop.eup %1153  ;;  %v584_v15 = vmul.f32 %v1152_v12, %v510_v57  ;;  %v586_v16 = vmul.f32 %v582_v11, %v549_v61 }
 0x18d   : > { %v585_v17 = vmul.f32 %v1154_v14, %v512_v59  ;;  %v587_v18 = vmul.f32 %v583_v13, %v551_v62 }
 0x18e   : > { %v588_v19 = vmul.f32 %v584_v15, %v553_v63 }
 0x18f   : > { %v589_v20 = vmul.f32 %v585_v17, %v555_v1 }
 0x190   : > { %v592_v21 = vpack.c.bf16 %v588_v19, %v586_v16 }
 0x191   : > { %v593_v22 = vpack.c.bf16 %v589_v20, %v587_v18 }
 0x193   : > { %754 = vmatprep.mubr.bf16.mxu0 %v593_v22 }
 0x194   : > { %755 = vmatmul.mubr.bf16.vlgmr.msra.gmra.mrb[4].mxu0 %v592_v21 }
 0x267   : > { %v980_v23 = vpop.f32.mrb[4].mxu0 }
 0x268   : > { %v981_v25 = vpop.f32.mrb[5].mxu0 }
 0x269   : > { %v982_v26 = vadd.f32 %v981_v25, %v980_v23  ;;  %v983_v27 = vpop.f32.mrb[6].mxu0  ;;  %770 = sbr.rel (%p957_p0) target bundleno = 632 (0x278), region = 52 }
 0x26a   : > { %v984_v29 = vpop.f32.mrb[7].mxu0 }
 0x26b   : > { %v763_v30 = vadd.f32 %v982_v26, %v590_v24  ;;  %v985_v31 = vadd.f32 %v984_v29, %v983_v27 }
 0x26d   : > { %765 = vst [vmem:[#allocation2] sm:$0xff] %v763_v30  ;;  %v764_v32 = vadd.f32 %v985_v31, %v591_v28 }
 0x26f   : > { %766 = vst [vmem:[#allocation2 + $0x8] sm:$0xff] %v764_v32 }
 0x274   : > { %v771_v33 = vld [vmem:[#allocation2] sm:$0xff] }
 0x275   : > { %773 = vst [vmem:[#allocation9] sm:$0xff] %v771_v33 }
 0x276   : > { %v772_v34 = vld [vmem:[#allocation2 + $0x8] sm:$0xff] }
 0x277   : > { %774 = vst [vmem:[#allocation9 + $0x8] sm:$0xff] %v772_v34 }
 0x278 PF: > { %p1012_p5 = scmp.eq.s32.totalorder %s1452_s30, 1  ;;  %s1341_s6 = smov [#allocation9]  }
 0x279   : > { %s785_s7 = sshll.u32 %s1341_s6, 4  ;;  %s786_s7 = int_to_ptr.vmem [resolvable:$true] %s785_s7 }
 0x27a   : > { %s1243_s19 = scalar_lea.vmem %s786_s7, 256  ;;  %p1250_p8 = scmp.lt.s32.totalorder %s786_s7, %s786_s7 }
 0x27b   : > { %p1244_p1 = scmp.ne.s32.totalorder %s786_s7, %s1243_s19  ;;  %p1251_p13 = scmp.lt.s32.totalorder %s1243_s19, %s1243_s19 }
 0x27d   : > { %p1245_p4 = pnand %p1244_p1, %p1012_p5  ;;  %p1252_p2 = por %p1251_p13, %p1250_p8 }
 0x27f   : > { %p1246_p7 = pneg %p1245_p4 }
 0x281   : > { %p1253_p3 = pnand %p1252_p2, %p1246_p7 }
 0x283   : > { %1256 = shalt.err (!%p1253_p3)
}
 0x284   : > { %s1257_s28 = scalar_lea.hbm %s1644_s3, 256 }
 0x285   : > { %p1258_p6 = scmp.ne.s32.totalorder %s1644_s3, %s1257_s28  ;;  %p1263_p10 = scmp.lt.u32.totalorder %s1257_s28, %s1644_s3 }
 0x287   : > { %p1259_p11 = pnand %p1258_p6, %p1012_p5 }
 0x289   : > { %p1260_p12 = pneg %p1259_p11 }
 0x28b   : > { %p1265_p9 = pnand %p1263_p10, %p1260_p12 }
 0x28d   : > { %1268 = shalt.err (!%p1265_p9)
}
 0x28e   : > { %s1342_s8 = smov 128   ;;  %s1343_s11 = smov 8  }
 0x28f   : > { %995 = dma.vmem_to_hbm [thread:$0]  (%p1012_p5), %s786_s7, 256, %s1644_s3, [#allocation5], %s1342_s8, %s1342_s8, %s1343_s11  }
 0x290   : > { %1302 = dma.done.wait (%p1012_p5), [#allocation5], 256  }
 0x291   : > { %1304 = vsyncadd (%p1012_p5), [#allocation5], 4294967040 }
 0x292 PF: > { %s18_s17 = sadd.s32 1, %s1327_s17   ;;  %s1662_s12 = smov %s1311_s13 }
 0x293   : > { %p15_p0 = scmp.ge.s32.totalorder %s18_s17, 4   ;;  %s1663_s13 = smov %s1315_s14 }
 0x294   : > { %s1664_s14 = smov %s1408_s24  ;;  %s1665_s15 = smov %s1323_s16 }
 0x295   : > { %s1666_s16 = smov %s1668_s18  ;;  %17 = sbr.rel (!%p15_p0) target bundleno = 6 (0x6), region = 95 }
 0x29c   :  { %801 = vsyncpa [#allocation4], 1 }
 0x29d   :  { %803 = vsyncpa [#allocation4 + $0x1], 1 }
 0x29e   :  { %804 = vsyncpa [#allocation7], 1 }
 0x29f   :  { %806 = vsyncpa [#allocation7 + $0x1], 1 }
 0x2a0   :  { %807 = vsyncpa [#allocation5], 1 }
 0x2a1   :  { %809 = vsyncpa [#allocation5 + $0x1], 1 }

</bundles_post_ra>
